<compile_context>
chip_gen: v7x
topology: tpu7x:2x2x1
jax: 0.10.0
libtpu: 0.0.40
codegen_flags: <defaults>
</compile_context>

<pallas_src>
import functools

import jax
import jax.numpy as jnp
from jax.experimental import pallas as pl
from jax.experimental.pallas import tpu as pltpu

_LANE = 128
_SUBLANE = 8
_NEG_COL = -1e30   # finite "minus infinity" baked into padded vocab columns


def _round_up(x, m):
    return ((x + m - 1) // m) * m


# ----------------------------- kernel helpers -----------------------------

def _lookup_logits(idx, w, tn, vp):
    """Embedding lookup as one-hot @ W on the MXU (exact f32 row gather)."""
    col = jax.lax.broadcasted_iota(jnp.int32, (tn, vp), 1)           # (TN, Vp)
    one_hot = (col == idx).astype(jnp.float32)                       # (TN, Vp)
    logits = jnp.dot(one_hot, w, preferred_element_type=jnp.float32,
                     precision=jax.lax.Precision.HIGHEST)            # (TN, Vp)
    return col, logits


def _per_row_ce(col, logits, tgt):
    """Stable log-softmax cross-entropy per row.

    Padded vocab columns already hold -1e30 (from the W column padding), so no
    extra mask is needed: they never win the max and exp() underflows to 0.
    """
    m = jnp.max(logits, axis=-1, keepdims=True)                      # (TN, 1)
    lse = m + jnp.log(jnp.sum(jnp.exp(logits - m), axis=-1, keepdims=True))
    tgt_logit = jnp.sum(jnp.where(col == tgt, logits, 0.0),
                        axis=-1, keepdims=True)                      # (TN, 1)
    return lse - tgt_logit                                           # (TN, 1)


def _mask_padded_rows(i, tn, n_tokens, tile_n, x):
    row = i * tile_n + jax.lax.broadcasted_iota(jnp.int32, (tn, 1), 0)
    return jnp.where(row < n_tokens, x, 0.0)


# --------------------------------- kernels ---------------------------------

def _logits_kernel(idx_ref, w_ref, logits_ref):
    tn, vp = logits_ref.shape
    _, logits = _lookup_logits(idx_ref[...], w_ref[...], tn, vp)
    logits_ref[...] = logits                                         # lane-dense vst


def _loss_logits_kernel(idx_ref, tgt_ref, w_ref, logits_ref, loss_ref,
                        *, n_tokens, tile_n):
    i = pl.program_id(0)
    tn, vp = logits_ref.shape
    col, logits = _lookup_logits(idx_ref[...], w_ref[...], tn, vp)
    logits_ref[...] = logits
    per_row = _per_row_ce(col, logits, tgt_ref[...])
    loss_ref[...] = _mask_padded_rows(i, tn, n_tokens, tile_n, per_row)


def _loss_only_kernel(idx_ref, tgt_ref, w_ref, loss_ref, *, n_tokens, tile_n):
    i = pl.program_id(0)
    tn = idx_ref.shape[0]
    vp = w_ref.shape[1]
    col, logits = _lookup_logits(idx_ref[...], w_ref[...], tn, vp)
    per_row = _per_row_ce(col, logits, tgt_ref[...])
    loss_ref[...] = _mask_padded_rows(i, tn, n_tokens, tile_n, per_row)


# --------------------------------- wrapper ---------------------------------

def _vmem_limit_bytes(tn, v_pad, n_col_streams, with_logits):
    # (TN, 1) blocks occupy a full 128-lane tile footprint in VMEM.
    col_blk = _round_up(tn, _SUBLANE) * _LANE * 4
    need = 2 * n_col_streams * col_blk + v_pad * v_pad * 4
    if with_logits:
        need += 2 * tn * v_pad * 4
    return int(min(max(need + (8 << 20), 16 << 20), 48 << 20))


def _finish_logits(logits_pad, B, T, V, V_pad, N, return_padded):
    if return_padded:
        # Skip the vocab-dim repack; only a row trim (no-op when N_pad == N).
        return logits_pad[:N].reshape(B, T, V_pad)
    return logits_pad[:N, :V].reshape(B, T, V)


def bigram_forward(idx, embedding_table, targets=None, *, tile_n=2048,
                   loss_only=False, return_padded_logits=False):
    """Mirror of BigramModel.forward: returns (logits, loss).

    loss_only=True (with targets) skips the logits HBM writeback and returns
    (None, loss).  return_padded_logits=True returns (B, T, 128) lane-padded
    logits to avoid the post-kernel vocab-dim slice copy.
    """
    B, T = idx.shape
    V = embedding_table.shape[0]
    N = B * T

    V_pad = _round_up(V, _LANE)
    tn = _round_up(min(tile_n, _round_up(N, _SUBLANE)), _SUBLANE)
    N_pad = _round_up(N, tn)
    grid = (N_pad // tn,)

    idx_flat = jnp.pad(idx.reshape(N, 1).astype(jnp.int32),
                       ((0, N_pad - N), (0, 0)))

    # Bake the vocab mask into the table: padded COLUMNS get -1e30 (finite, so
    # the one-hot matmul never produces NaN); padded ROWS (never selected,
    # since idx < V and padded ids are 0) are zeros.
    w = embedding_table.astype(jnp.float32)
    w_pad = jnp.pad(w, ((0, 0), (0, V_pad - V)), constant_values=_NEG_COL)
    w_pad = jnp.pad(w_pad, ((0, V_pad - V), (0, 0)))

    col_spec = pl.BlockSpec((tn, 1), lambda i: (i, 0))
    w_spec = pl.BlockSpec((V_pad, V_pad), lambda i: (0, 0))          # resident
    logits_spec = pl.BlockSpec((tn, V_pad), lambda i: (i, 0))
    loss_spec = pl.BlockSpec((tn, 1), lambda i: (i, 0))

    if targets is None:
        logits_pad = pl.pallas_call(
            _logits_kernel,
            grid=grid,
            out_shape=jax.ShapeDtypeStruct((N_pad, V_pad), jnp.float32),
            in_specs=[col_spec, w_spec],
            out_specs=logits_spec,
            compiler_params=pltpu.CompilerParams(
                dimension_semantics=("parallel",),
                vmem_limit_bytes=_vmem_limit_bytes(tn, V_pad, 1, True)),
            cost_estimate=pl.CostEstimate(
                flops=2 * N_pad * V_pad * V_pad,
                transcendentals=0,
                bytes_accessed=(N_pad * V_pad * 4 + N_pad * 4
                                + V_pad * V_pad * 4)),
        )(idx_flat, w_pad)
        logits = _finish_logits(logits_pad, B, T, V, V_pad, N,
                                return_padded_logits)
        return logits, None

    tgt_flat = jnp.pad(targets.reshape(N, 1).astype(jnp.int32),
                       ((0, N_pad - N), (0, 0)))
    loss_rows_shape = jax.ShapeDtypeStruct((N_pad, 1), jnp.float32)

    if loss_only:
        kernel = functools.partial(_loss_only_kernel, n_tokens=N, tile_n=tn)
        loss_rows = pl.pallas_call(
            kernel,
            grid=grid,
            out_shape=loss_rows_shape,
            in_specs=[col_spec, col_spec, w_spec],
            out_specs=loss_spec,
            compiler_params=pltpu.CompilerParams(
                dimension_semantics=("parallel",),
                vmem_limit_bytes=_vmem_limit_bytes(tn, V_pad, 3, False)),
            cost_estimate=pl.CostEstimate(
                flops=2 * N_pad * V_pad * V_pad + 5 * N_pad * V_pad,
                transcendentals=N_pad * V_pad,
                bytes_accessed=3 * N_pad * 4 + V_pad * V_pad * 4),
        )(idx_flat, tgt_flat, w_pad)
        loss = jnp.sum(loss_rows) / N          # cross_entropy reduction='mean'
        return None, loss

    kernel = functools.partial(_loss_logits_kernel, n_tokens=N, tile_n=tn)
    logits_pad, loss_rows = pl.pallas_call(
        kernel,
        grid=grid,
        out_shape=(jax.ShapeDtypeStruct((N_pad, V_pad), jnp.float32),
                   loss_rows_shape),
        in_specs=[col_spec, col_spec, w_spec],
        out_specs=(logits_spec, loss_spec),
        compiler_params=pltpu.CompilerParams(
            dimension_semantics=("parallel",),
            vmem_limit_bytes=_vmem_limit_bytes(tn, V_pad, 3, True)),
        cost_estimate=pl.CostEstimate(
            flops=2 * N_pad * V_pad * V_pad + 5 * N_pad * V_pad,
            transcendentals=N_pad * V_pad,
            bytes_accessed=(N_pad * V_pad * 4 + 3 * N_pad * 4
                            + V_pad * V_pad * 4)),
    )(idx_flat, tgt_flat, w_pad)

    loss = jnp.sum(loss_rows) / N              # cross_entropy reduction='mean'
    logits = _finish_logits(logits_pad, B, T, V, V_pad, N, return_padded_logits)
    return logits, loss


if __name__ == "__main__":
    # Small, deterministic synthetic setup (nanoGPT char vocab ~65 symbols).
    vocab_size = 65
    B, T = 2, 8

    key = jax.random.PRNGKey(0)
    k_emb, k_idx, k_tgt = jax.random.split(key, 3)

    # nn.Embedding default init: N(0, 1)
    embedding_table = jax.random.normal(k_emb, (vocab_size, vocab_size),
                                        dtype=jnp.float32)
    idx = jax.random.randint(k_idx, (B, T), 0, vocab_size, dtype=jnp.int32)
    targets = jax.random.randint(k_tgt, (B, T), 0, vocab_size, dtype=jnp.int32)

    # Reference in plain JAX (embedding gather + mean cross-entropy).
    ref_logits = embedding_table[idx]                                # (B, T, V)
    lsm = jax.nn.log_softmax(ref_logits.reshape(B * T, vocab_size), axis=-1)
    ref_loss = -jnp.mean(lsm[jnp.arange(B * T), targets.reshape(-1)])

    # 1) Full forward (logits + loss).
    logits, loss = bigram_forward(idx, embedding_table, targets)
    jax.block_until_ready((logits, loss))
    assert logits.shape == (B, T, vocab_size)
    assert jnp.allclose(logits, ref_logits, atol=1e-5)
    assert jnp.allclose(loss, ref_loss, atol=1e-5)

    # 2) Logits-only path (targets=None), like forward(idx).
    logits_only, loss_none = bigram_forward(idx, embedding_table, None)
    jax.block_until_ready(logits_only)
    assert loss_none is None
    assert jnp.allclose(logits_only, ref_logits, atol=1e-5)

    # 3) Loss-only path (no logits HBM writeback at all).
    no_logits, loss_lo = bigram_forward(idx, embedding_table, targets,
                                        loss_only=True)
    jax.block_until_ready(loss_lo)
    assert no_logits is None
    assert jnp.allclose(loss_lo, ref_loss, atol=1e-5)

    # 4) Lane-padded logits return (skips the vocab-dim repack copy).
    logits_padded, loss_p = bigram_forward(idx, embedding_table, targets,
                                           return_padded_logits=True)
    jax.block_until_ready((logits_padded, loss_p))
    assert logits_padded.shape == (B, T, 128)
    assert jnp.allclose(logits_padded[..., :vocab_size], ref_logits, atol=1e-5)
    assert jnp.allclose(loss_p, ref_loss, atol=1e-5)

    # 5) Multi-tile grid (N > tile) to exercise the pipelined, multi-step path.
    B2, T2 = 16, 96                                                  # N = 1536
    idx2 = jax.random.randint(k_idx, (B2, T2), 0, vocab_size, dtype=jnp.int32)
    tgt2 = jax.random.randint(k_tgt, (B2, T2), 0, vocab_size, dtype=jnp.int32)
    logits2, loss2 = bigram_forward(idx2, embedding_table, tgt2, tile_n=256)
    jax.block_until_ready((logits2, loss2))
    ref_logits2 = embedding_table[idx2]
    lsm2 = jax.nn.log_softmax(ref_logits2.reshape(B2 * T2, vocab_size), axis=-1)
    ref_loss2 = -jnp.mean(lsm2[jnp.arange(B2 * T2), tgt2.reshape(-1)])
    assert jnp.allclose(logits2, ref_logits2, atol=1e-5)
    assert jnp.allclose(loss2, ref_loss2, atol=1e-4)

    # TODO(synk): generate() (autoregressive multinomial sampling) is a
    # host-side sampling loop, not a kernel hot path; intentionally omitted.

    print("KERNEL_OK")
</pallas_src>

<mosaic_0001>
module attributes {stable_mosaic.version = 11 : i64} {
  func.func @_loss_logits_kernel(%arg0: i32, %arg1: memref<16x1xi32, #tpu.memory_space<vmem>>, %arg2: memref<16x1xi32, #tpu.memory_space<vmem>>, %arg3: memref<128x128xf32, #tpu.memory_space<vmem>>, %arg4: memref<16x128xf32, #tpu.memory_space<vmem>>, %arg5: memref<16x1xf32, #tpu.memory_space<vmem>>) attributes {dimension_semantics = [#tpu.dimension_semantics<parallel>], iteration_bounds = array<i64: 1>, scalar_prefetch = 0 : i64, scratch_operands = 0 : i64, tpu.core_type = #tpu.core_type<tc>, window_params = [{transform_indices = @transform_0, window_bounds = array<i64: 16, 1>}, {transform_indices = @transform_1, window_bounds = array<i64: 16, 1>}, {pipeline_mode = #tpu.pipeline_mode<synchronous>, transform_indices = @transform_2, window_bounds = array<i64: 128, 128>}, {transform_indices = @transform_3, window_bounds = array<i64: 16, 128>}, {transform_indices = @transform_4, window_bounds = array<i64: 16, 1>}]} {
    %c0 = arith.constant 0 : index
    %c0_0 = arith.constant 0 : index
    %0 = vector.load %arg1[%c0, %c0_0] : memref<16x1xi32, #tpu.memory_space<vmem>>, vector<16x1xi32>
    %c0_1 = arith.constant 0 : index
    %c0_2 = arith.constant 0 : index
    %1 = vector.load %arg3[%c0_1, %c0_2] : memref<128x128xf32, #tpu.memory_space<vmem>>, vector<128x128xf32>
    %2 = tpu.iota {dimensions = array<i32: 1>} : vector<16x128xi32>
    %3 = vector.broadcast %0 : vector<16x1xi32> to vector<16x128xi32>
    %4 = arith.cmpi eq, %2, %3 : vector<16x128xi32>
    %5 = arith.extui %4 : vector<16x128xi1> to vector<16x128xi32>
    %6 = arith.sitofp %5 : vector<16x128xi32> to vector<16x128xf32>
    %cst = arith.constant dense<0.000000e+00> : vector<16x128xf32>
    %7 = tpu.matmul %6, %1, %cst {dimension_numbers = #tpu.dot_dimension_numbers<[1], [0], [0], [1], [0, 0, 1, 1], [], []>, precision = #tpu.contract_precision<fp32>} : vector<16x128xf32>, vector<128x128xf32>, vector<16x128xf32> -> vector<16x128xf32>
    %c0_3 = arith.constant 0 : index
    %c0_4 = arith.constant 0 : index
    %8 = vector.load %arg4[%c0_3, %c0_4] : memref<16x128xf32, #tpu.memory_space<vmem>>, vector<16x128xf32>
    tpu.vector_store %arg4[%c0_3, %c0_4], %7 {strides = array<i32>} : memref<16x128xf32, #tpu.memory_space<vmem>>, vector<16x128xf32>,
    %c0_5 = arith.constant 0 : index
    %c0_6 = arith.constant 0 : index
    %9 = vector.load %arg2[%c0_5, %c0_6] : memref<16x1xi32, #tpu.memory_space<vmem>>, vector<16x1xi32>
    %cst_7 = arith.constant dense<0xFF800000> : vector<16xf32>
    %10 = vector.multi_reduction <maximumf>, %7, %cst_7 [1] : vector<16x128xf32> to vector<16xf32>
    %11 = vector.shape_cast %10 : vector<16xf32> to vector<16x1xf32>
    %12 = vector.broadcast %11 : vector<16x1xf32> to vector<16x128xf32>
    %13 = arith.subf %7, %12 : vector<16x128xf32>
    %14 = math.exp %13 : vector<16x128xf32>
    %cst_8 = arith.constant dense<0.000000e+00> : vector<16xf32>
    %15 = vector.multi_reduction <add>, %14, %cst_8 [1] : vector<16x128xf32> to vector<16xf32>
    %16 = vector.shape_cast %15 : vector<16xf32> to vector<16x1xf32>
    %17 = math.log %16 : vector<16x1xf32>
    %18 = arith.addf %11, %17 : vector<16x1xf32>
    %19 = vector.broadcast %9 : vector<16x1xi32> to vector<16x128xi32>
    %20 = arith.cmpi eq, %2, %19 : vector<16x128xi32>
    %cst_9 = arith.constant 0.000000e+00 : f32
    %21 = vector.broadcast %cst_9 : f32 to vector<16x128xf32>
    %22 = arith.select %20, %7, %21 : vector<16x128xi1>, vector<16x128xf32>
    %cst_10 = arith.constant dense<0.000000e+00> : vector<16xf32>
    %23 = vector.multi_reduction <add>, %22, %cst_10 [1] : vector<16x128xf32> to vector<16xf32>
    %24 = vector.shape_cast %23 : vector<16xf32> to vector<16x1xf32>
    %25 = arith.subf %18, %24 : vector<16x1xf32>
    %c16_i32 = arith.constant 16 : i32
    %26 = arith.muli %arg0, %c16_i32 : i32
    %27 = tpu.iota {dimensions = array<i32: 0>} : vector<16x1xi32>
    %28 = vector.broadcast %26 : i32 to vector<16x1xi32>
    %29 = arith.addi %28, %27 : vector<16x1xi32>
    %c16_i32_11 = arith.constant 16 : i32
    %30 = vector.broadcast %c16_i32_11 : i32 to vector<16x1xi32>
    %31 = arith.cmpi slt, %29, %30 : vector<16x1xi32>
    %cst_12 = arith.constant 0.000000e+00 : f32
    %32 = vector.broadcast %cst_12 : f32 to vector<16x1xf32>
    %33 = arith.select %31, %25, %32 : vector<16x1xi1>, vector<16x1xf32>
    %c0_13 = arith.constant 0 : index
    %c0_14 = arith.constant 0 : index
    %34 = vector.load %arg5[%c0_13, %c0_14] : memref<16x1xf32, #tpu.memory_space<vmem>>, vector<16x1xf32>
    tpu.vector_store %arg5[%c0_13, %c0_14], %33 {strides = array<i32>} : memref<16x1xf32, #tpu.memory_space<vmem>>, vector<16x1xf32>,
    return
  }
  func.func @transform_0(%arg0: i32) -> (i32, i32) {
    %c0_i32 = arith.constant 0 : i32
    %c0_i32_0 = arith.constant 0 : i32
    return %arg0, %c0_i32 : i32, i32
  }
  func.func @transform_1(%arg0: i32) -> (i32, i32) {
    %c0_i32 = arith.constant 0 : i32
    %c0_i32_0 = arith.constant 0 : i32
    return %arg0, %c0_i32 : i32, i32
  }
  func.func @transform_2(%arg0: i32) -> (i32, i32) {
    %c0_i32 = arith.constant 0 : i32
    %c0_i32_0 = arith.constant 0 : i32
    %c0_i32_1 = arith.constant 0 : i32
    return %c0_i32, %c0_i32_0 : i32, i32
  }
  func.func @transform_3(%arg0: i32) -> (i32, i32) {
    %c0_i32 = arith.constant 0 : i32
    %c0_i32_0 = arith.constant 0 : i32
    return %arg0, %c0_i32 : i32, i32
  }
  func.func @transform_4(%arg0: i32) -> (i32, i32) {
    %c0_i32 = arith.constant 0 : i32
    %c0_i32_0 = arith.constant 0 : i32
    return %arg0, %c0_i32 : i32, i32
  }
}

</mosaic_0001>

<bundles_post_ra>
// kernel: tpu_custom_call.1
= control target key start
LH: loop header
LB: loop body
LE: loop exit
PB: predicated region body
PF: predicated region fallthrough
CT: control target
= control target key end

     0   :  { %10 = vsyncpa [#allocation3], 0  ;;  %s1753_s0 = inlined_call_operand.vmem [shape: s32[16,1], index: 0, kind: input, shape index: {}]   ;;  %s1754_s1 = inlined_call_operand.vmem [shape: s32[16,1], index: 1, kind: input, shape index: {}]   ;;  %s1755_s2 = inlined_call_operand.hbm [shape: f32[128,128], index: 2, kind: input, shape index: {}]   ;;  %s1756_s3 = inlined_call_operand.hbm [shape: f32[16,128], index: 3, kind: output, shape index: {0}]   ;;  %s1757_s4 = inlined_call_operand.vmem [shape: f32[16,1], index: 4, kind: output, shape index: {1}]  }
   0x1   :  { %11 = vsyncpa [#allocation4], 0  ;;  %s1415_s15 = smov [#allocation2]   ;;  %s1367_s19 = scalar_lea.hbm %s1755_s2, 2048 }
   0x2   :  { %s21_s16 = sshll.u32 %s1415_s15, 4  ;;  %p1368_p0 = scmp.ne.s32.totalorder %s1755_s2, %s1367_s19  ;;  %s22_s16 = int_to_ptr.vmem [resolvable:$true] %s21_s16 }
   0x3   :  { %p1371_p1 = scmp.lt.u32.totalorder %s1367_s19, %s1755_s2 }
   0x5   :  { %p1373_p2 = pnand %p1371_p1, %p1368_p0 }
   0x7   :  { %1376 = shalt.err (!%p1373_p2)
}
   0x8   :  { %s1377_s24 = scalar_lea.vmem %s22_s16, 2048  ;;  %p1382_p4 = scmp.lt.s32.totalorder %s22_s16, %s22_s16 }
   0x9   :  { %p1378_p3 = scmp.ne.s32.totalorder %s22_s16, %s1377_s24  ;;  %p1383_p5 = scmp.lt.s32.totalorder %s1377_s24, %s1377_s24 }
   0xb   :  { %p1384_p6 = por %p1383_p5, %p1382_p4 }
   0xd   :  { %p1385_p7 = pnand %p1384_p6, %p1378_p3 }
   0xf   :  { %1388 = shalt.err (!%p1385_p7)
}
  0x10   :  { %s1416_s25 = smov 128   ;;  %s1417_s26 = smov 8  }
  0x11   :  { %27 = dma.hbm_to_vmem [thread:$0]  %s1755_s2, 2048, %s22_s16, [#allocation3], %s1416_s25, %s1416_s25, %s1417_s26  }
  0x12   :  { %1411 = dma.done.wait [#allocation3], 2048  }
  0x13   :  { %1412 = vsyncadd [#allocation3], 4294965248  ;;  %v1418_v0 = vmov 0   ;;  %v31_v1 = vld [vmem:[%s1753_s0] sm:$0xff]  ;;  %v32_v2 = vld [vmem:[%s1753_s0 + $0x8] sm:$0xff] }
  0x14   :  { %1357 = vset.pattern.permute.xlu0 %v1418_v0  ;;  %1358 = vset.pattern.permute.xlu1 %v1418_v0  ;;  %v33_v3 = vld [vmem:[#allocation2] sm:$0xff]  ;;  %v34_v4 = vld [vmem:[#allocation2 + $0x8] sm:$0xff]  ;;  %v35_v5 = vld [vmem:[#allocation2 + $0x10] sm:$0xff] }
  0x15   :  { %52 = vperm.xlu0 %1357, %v31_v1   ;;  %v64_v6 = vand.u32 4294901760, %v33_v3  ;;  %v67_v7 = vand.u32 4294901760, %v34_v4  ;;  %v36_v8 = vld [vmem:[#allocation2 + $0x18] sm:$0xff]  ;;  %v70_v9 = vand.u32 4294901760, %v35_v5  ;;  %v37_v10 = vld [vmem:[#allocation2 + $0x20] sm:$0xff]  ;;  %v38_v11 = vld [vmem:[#allocation2 + $0x28] sm:$0xff] }
  0x16   :  { %v73_v12 = vand.u32 4294901760, %v36_v8  ;;  %v76_v14 = vand.u32 4294901760, %v37_v10  ;;  %v79_v15 = vand.u32 4294901760, %v38_v11  ;;  %v39_v17 = vld [vmem:[#allocation2 + $0x30] sm:$0xff]  ;;  %v40_v18 = vld [vmem:[#allocation2 + $0x38] sm:$0xff]  ;;  %v749_v19 = vld [vmem:[%s1754_s1] sm:$0xff] }
  0x17   :  { %v1468_v13 = vpack.c.bf16 %v67_v7, %v64_v6  ;;  %v82_v21 = vand.u32 4294901760, %v39_v17  ;;  %v85_v22 = vand.u32 4294901760, %v40_v18  ;;  %v41_v23 = vld [vmem:[#allocation2 + $0x40] sm:$0xff]  ;;  %v42_v24 = vld [vmem:[#allocation2 + $0x48] sm:$0xff]  ;;  %v1483_v25 = vsub.f32 %v35_v5, %v70_v9  ;;  %v1489_v29 = vld [vmem:[#allocation2 + $0x50] sm:$0xff] }
  0x18   :  { %v1470_v16 = vpack.c.bf16 %v73_v12, %v70_v9  ;;  %v1481_v20 = vpack.c.bf16 %v79_v15, %v76_v14  ;;  %v1485_v26 = vsub.f32 %v36_v8, %v73_v12  ;;  %v88_v27 = vand.u32 4294901760, %v41_v23  ;;  %v1497_v33 = vld [vmem:[#allocation2 + $0x58] sm:$0xff]  ;;  %v1513_v42 = vld [vmem:[#allocation2 + $0x60] sm:$0xff]  ;;  %v1517_v45 = vld [vmem:[#allocation2 + $0x68] sm:$0xff] }
  0x19   :  { %55 = vperm.xlu0 %1357, %v32_v2   ;;  %1245 = vmatprep.subr.bf16.mxu0 %v1468_v13  ;;  %v91_v28 = vand.u32 4294901760, %v42_v24  ;;  %v181_v30 = vand.u32 4294901760, %v1483_v25  ;;  %v1495_v32 = vpack.c.bf16 %v85_v22, %v82_v21  ;;  %v94_v37 = vand.u32 4294901760, %v1489_v29  ;;  %v1541_v59 = vld [vmem:[#allocation2 + $0x70] sm:$0xff]  ;;  %v48_v62 = vld [vmem:[#allocation2 + $0x78] sm:$0xff] }
  0x1a   :  { %1149 = vmatprep.subr.bf16.mxu1 %v1468_v13  ;;  %1247 = vmatpush3.bf16.msra.mxu0 %v1468_v13  ;;  %v188_v31 = vand.u32 4294901760, %v1485_v26  ;;  %v1504_v38 = vsub.f32 %v37_v10, %v76_v14  ;;  %v1506_v39 = vsub.f32 %v38_v11, %v79_v15  ;;  %v97_v41 = vand.u32 4294901760, %v1497_v33 }
  0x1b   :  { %1151 = vmatpush3.bf16.msra.mxu1 %v1468_v13  ;;  %1249 = vmatprep.subr.bf16.mxu0 %v1470_v16  ;;  %v182_v35 = vsub.f32 %v1483_v25, %v181_v30  ;;  %v1510_v40 = vpack.c.bf16 %v91_v28, %v88_v27  ;;  %v1519_v46 = vsub.f32 %v33_v3, %v64_v6  ;;  %v100_v53 = vand.u32 4294901760, %v1513_v42 }
  0x1c   :  { %1153 = vmatprep.subr.bf16.mxu1 %v1470_v16  ;;  %v1499_v34 = vpack.c.bf16 %v188_v31, %v181_v30  ;;  %v189_v36 = vsub.f32 %v1485_v26, %v188_v31  ;;  %v1521_v47 = vsub.f32 %v34_v4, %v67_v7  ;;  %v195_v48 = vand.u32 4294901760, %v1504_v38 }
  0x1d   :  { %772 = vperm.xlu0 %1357, %v749_v19   ;;  %v183_v43 = vand.u32 4294901760, %v182_v35  ;;  %v202_v49 = vand.u32 4294901760, %v1506_v39  ;;  %v1527_v51 = vsub.f32 %v39_v17, %v82_v21  ;;  %v1529_v52 = vsub.f32 %v40_v18, %v85_v22 }
  0x1e   :  { %1251 = vmatpush3.bf16.msra.mxu0 %v1470_v16  ;;  %v190_v44 = vand.u32 4294901760, %v189_v36  ;;  %v196_v55 = vsub.f32 %v1504_v38, %v195_v48  ;;  %v1538_v57 = vpack.c.bf16 %v97_v41, %v94_v37  ;;  %v103_v58 = vand.u32 4294901760, %v1517_v45 }
  0x1f   :  { %1155 = vmatpush3.bf16.msra.mxu1 %v1470_v16  ;;  %1253 = vmatprep.subr.bf16.mxu0 %v1481_v20  ;;  %v1532_v54 = vpack.c.bf16 %v202_v49, %v195_v48  ;;  %v203_v56 = vsub.f32 %v1506_v39, %v202_v49  ;;  %v209_v60 = vand.u32 4294901760, %v1527_v51  ;;  %v216_v61 = vand.u32 4294901760, %v1529_v52 }
  0x20   :  { %1157 = vmatprep.subr.bf16.mxu1 %v1481_v20  ;;  %v1525_v50 = vpack.c.bf16 %v190_v44, %v183_v43  ;;  %v167_v63 = vand.u32 4294901760, %v1519_v46  ;;  %v174_v0 = vand.u32 4294901760, %v1521_v47  ;;  %v197_v1 = vand.u32 4294901760, %v196_v55 }
  0x21   :  { %v204_v2 = vand.u32 4294901760, %v203_v56  ;;  %v1549_v3 = vpack.c.bf16 %v216_v61, %v209_v60  ;;  %v210_v4 = vsub.f32 %v1527_v51, %v209_v60  ;;  %v217_v5 = vsub.f32 %v1529_v52, %v216_v61 }
  0x22   :  { %1255 = vmatpush3.bf16.msra.mxu0 %v1481_v20  ;;  %v1553_v6 = vsub.f32 %v41_v23, %v88_v27  ;;  %v106_v7 = vand.u32 4294901760, %v1541_v59  ;;  %v1558_v9 = vsub.f32 %v42_v24, %v91_v28  ;;  %v109_v10 = vand.u32 4294901760, %v48_v62 }
  0x23   :  { %1159 = vmatpush3.bf16.msra.mxu1 %v1481_v20  ;;  %1257 = vmatprep.subr.bf16.mxu0 %v1495_v32  ;;  %v1556_v8 = vpack.c.bf16 %v204_v2, %v197_v1  ;;  %v211_v11 = vand.u32 4294901760, %v210_v4  ;;  %v218_v12 = vand.u32 4294901760, %v217_v5  ;;  %v1565_v15 = vpack.c.bf16 %v103_v58, %v100_v53 }
  0x24   :  { %1161 = vmatprep.subr.bf16.mxu1 %v1495_v32  ;;  %v223_v14 = vand.u32 4294901760, %v1553_v6  ;;  %v168_v17 = vsub.f32 %v1519_v46, %v167_v63  ;;  %v175_v18 = vsub.f32 %v1521_v47, %v174_v0  ;;  %v230_v19 = vand.u32 4294901760, %v1558_v9 }
  0x25   :  { %v1570_v21 = vpack.c.bf16 %v218_v12, %v211_v11  ;;  %v236_v23 = vsub.f32 %v1489_v29, %v94_v37  ;;  %v243_v24 = vsub.f32 %v1497_v33, %v97_v41  ;;  %v1582_v36 = vpack.c.bf16 %v109_v10, %v106_v7 }
  0x26   :  { %1259 = vmatpush3.bf16.msra.mxu0 %v1495_v32  ;;  %v224_v22 = vsub.f32 %v1553_v6, %v223_v14  ;;  %v1575_v27 = vpack.c.bf16 %v230_v19, %v223_v14  ;;  %v231_v28 = vsub.f32 %v1558_v9, %v230_v19  ;;  %v169_v29 = vand.u32 4294901760, %v168_v17 }
  0x27   :  { %1163 = vmatpush3.bf16.msra.mxu1 %v1495_v32  ;;  %1261 = vmatprep.subr.bf16.mxu0 %v1510_v40  ;;  %v237_v31 = vand.u32 4294901760, %v236_v23  ;;  %v244_v35 = vand.u32 4294901760, %v243_v24  ;;  %v176_v37 = vand.u32 4294901760, %v175_v18  ;;  %v250_v48 = vsub.f32 %v1513_v42, %v100_v53 }
  0x28   :  { %1165 = vmatprep.subr.bf16.mxu1 %v1510_v40  ;;  %v225_v30 = vand.u32 4294901760, %v224_v22  ;;  %v232_v33 = vand.u32 4294901760, %v231_v28  ;;  %v257_v55 = vsub.f32 %v1517_v45, %v103_v58  ;;  %v1276_v1 = vpack.c.bf16 %v174_v0, %v167_v63 }
  0x29   :  { %v1584_v41 = vpack.c.bf16 %v244_v35, %v237_v31  ;;  %v238_v43 = vsub.f32 %v236_v23, %v237_v31  ;;  %v245_v44 = vsub.f32 %v243_v24, %v244_v35  ;;  %v251_v61 = vand.u32 4294901760, %v250_v48 }
  0x2a   :  { %1263 = vmatpush3.bf16.msra.mxu0 %v1510_v40  ;;  %v1587_v49 = vpack.c.bf16 %v232_v33, %v225_v30  ;;  %v1180_v2 = vpack.c.bf16 %v176_v37, %v169_v29  ;;  %v258_v4 = vand.u32 4294901760, %v257_v55  ;;  %v264_v53 = vsub.f32 %v1541_v59, %v106_v7 }
  0x2b   :  { %1167 = vmatpush3.bf16.msra.mxu1 %v1510_v40  ;;  %1265 = vmatprep.subr.bf16.mxu0 %v1538_v57  ;;  %v239_v56 = vand.u32 4294901760, %v238_v43  ;;  %v246_v60 = vand.u32 4294901760, %v245_v44  ;;  %v252_v42 = vsub.f32 %v250_v48, %v251_v61  ;;  %v271_v45 = vsub.f32 %v48_v62, %v109_v10 }
  0x2c   :  { %1169 = vmatprep.subr.bf16.mxu1 %v1538_v57  ;;  %v1597_v58 = vpack.c.bf16 %v258_v4, %v251_v61  ;;  %v259_v11 = vsub.f32 %v257_v55, %v258_v4  ;;  %v265_v14 = vand.u32 4294901760, %v264_v53  ;;  %v1607_v10 = vpack.c.bf16 %v1521_v47, %v1519_v46 }
  0x2d   :  { %v1594_v5 = vpack.c.bf16 %v246_v60, %v239_v56  ;;  %v253_v12 = vand.u32 4294901760, %v252_v42  ;;  %v272_v17 = vand.u32 4294901760, %v271_v45  ;;  %v1611_v28 = vpack.c.bf16 %v1485_v26, %v1483_v25 }
  0x2e   :  { %1267 = vmatpush3.bf16.msra.mxu0 %v1538_v57  ;;  %v260_v63 = vand.u32 4294901760, %v259_v11  ;;  %v266_v18 = vsub.f32 %v264_v53, %v265_v14  ;;  %v1615_v30 = vpack.c.bf16 %v1506_v39, %v1504_v38  ;;  %v1619_v31 = vpack.c.bf16 %v1529_v52, %v1527_v51 }
  0x2f   :  { %1171 = vmatpush3.bf16.msra.mxu1 %v1538_v57  ;;  %1269 = vmatprep.subr.bf16.mxu0 %v1565_v15  ;;  %v1601_v0 = vpack.c.bf16 %v272_v17, %v265_v14  ;;  %v273_v19 = vsub.f32 %v271_v45, %v272_v17  ;;  %v1623_v35 = vpack.c.bf16 %v1558_v9, %v1553_v6  ;;  %v49_v25 = vlaneseq }
  0x30   :  { %1173 = vmatprep.subr.bf16.mxu1 %v1565_v15  ;;  %v1204_v22 = vpack.c.bf16 %v260_v63, %v253_v12  ;;  %v267_v59 = vand.u32 4294901760, %v266_v18  ;;  %v1625_v29 = vpack.c.bf16 %v243_v24, %v236_v23  ;;  %v1627_v46 = vpack.c.bf16 %v257_v55, %v250_v48 }
  0x31   :  { %v274_v62 = vand.u32 4294901760, %v273_v19  ;;  %v1629_v47 = vpack.c.bf16 %v271_v45, %v264_v53  ;;  %v1631_v26 = vand.u32 127, %v49_v25  ;;  %v1419_v38 = vmov 0.0  }
  0x32   :  { %1271 = vmatpush3.bf16.msra.mxu0 %v1565_v15  ;;  %v1420_v48 = vmov 1.0  }
  0x33   :  { %1175 = vmatpush3.bf16.msra.mxu1 %v1565_v15  ;;  %1273 = vmatprep.subr.bf16.mxu0 %v1582_v36  ;;  %v1603_v7 = vpack.c.bf16 %v274_v62, %v267_v59 }
  0x34   :  { %1177 = vmatprep.subr.bf16.mxu1 %v1582_v36 }
  0x36   :  { %1275 = vmatpush3.bf16.msra.mxu0 %v1582_v36 }
  0x37   :  { %1179 = vmatpush3.bf16.msra.mxu1 %v1582_v36  ;;  %1277 = vmatprep.subr.bf16.mxu0 %v1276_v1 }
  0x38   :  { %1181 = vmatprep.subr.bf16.mxu1 %v1180_v2 }
  0x94   :  { %v53_v37 = vpop.permute.xlu0 %52 }
  0x95   :  { %vm57_vm0 = vcmp.eq.s32.totalorder %v1631_v26, %v53_v37 }
  0x96   :  { %v822_v39 = vsel %vm57_vm0, 1.0, %v1419_v38 }
  0x97   :  { %v145_v51 = vsub.f32 %v822_v39, %v822_v39 }
  0x98   :  { %v1636_v52 = vpop.permute.xlu0 %55 }
  0x99   :  { %vm58_vm1 = vcmp.eq.s32.totalorder %v1631_v26, %v1636_v52  ;;  %v146_v6 = vand.u32 4294901760, %v145_v51 }
  0x9a   :  { %v823_v9 = vsel %vm58_vm1, 1.0, %v1419_v38 }
  0x9b   :  { %v1643_v23 = vsub.f32 %v823_v9, %v823_v9  ;;  %1075 = vmatprep.mubr.f32.mxu0 %v146_v6  ;;  %v147_v24 = vsub.f32 %v145_v51, %v146_v6 }
  0x9d   :  { %v148_v33 = vand.u32 4294901760, %v147_v24  ;;  %v156_v43 = vand.u32 4294901760, %v1643_v23 }
  0x9f   :  { %970 = vmatprep.mubr.f32.mxu1 %v148_v33  ;;  %1076 = vmatmul.mubr.f32.vlgmr.msra.gmra.mrb[0].mxu0 %v156_v43  ;;  %v157_v44 = vsub.f32 %v1643_v23, %v156_v43 }
  0xa0   :  { %1279 = vmatpush3.bf16.msra.mxu0 %v1276_v1  ;;  %1110 = vmatprep.mubr.msk.f32.mxu0 %vm57_vm0, %v1420_v48 }
  0xa1   :  { %1281 = vmatprep.subr.bf16.mxu0 %v1499_v34  ;;  %v158_v55 = vand.u32 4294901760, %v157_v44 }
  0xa3   :  { %971 = vmatmul.mubr.f32.vlgmr.msra.gmra.mrb[0].mxu1 %v158_v55 }
  0xa4   :  { %1183 = vmatpush3.bf16.msra.mxu1 %v1180_v2  ;;  %1283 = vmatpush3.bf16.msra.mxu0 %v1499_v34 }
  0xa5   :  { %1005 = vmatprep.mubr.msk.f32.mxu1 %vm57_vm0, %v1420_v48  ;;  %1185 = vmatprep.subr.bf16.mxu1 %v1525_v50 }
  0xa6   :  { %1285 = vmatprep.subr.bf16.mxu0 %v1532_v54 }
  0xa8   :  { %1187 = vmatpush3.bf16.msra.mxu1 %v1525_v50  ;;  %1287 = vmatpush3.bf16.msra.mxu0 %v1532_v54  ;;  %v750_v50 = vld [vmem:[%s1754_s1 + $0x8] sm:$0xff]  ;;  %s1421_s1 = smov [#allocation5]  }
  0xa9   :  { %1189 = vmatprep.subr.bf16.mxu1 %v1556_v8  ;;  %1289 = vmatprep.subr.bf16.mxu0 %v1549_v3  ;;  %s806_s9 = sshll.u32 %s1421_s1, 4  ;;  %s807_s9 = int_to_ptr.vmem [resolvable:$true] %s806_s9 }
  0xaa   :  { %s1389_s10 = scalar_lea.vmem %s807_s9, 256  ;;  %p1394_p9 = scmp.lt.s32.totalorder %s807_s9, %s807_s9 }
  0xab   :  { %p1390_p8 = scmp.ne.s32.totalorder %s807_s9, %s1389_s10  ;;  %p1395_p10 = scmp.lt.s32.totalorder %s1389_s10, %s1389_s10 }
  0xac   :  { %1191 = vmatpush3.bf16.msra.mxu1 %v1556_v8  ;;  %1291 = vmatpush3.bf16.msra.mxu0 %v1549_v3 }
  0xad   :  { %1193 = vmatprep.subr.bf16.mxu1 %v1570_v21  ;;  %1293 = vmatprep.subr.bf16.mxu0 %v1575_v27  ;;  %p1396_p11 = por %p1395_p10, %p1394_p9 }
  0xaf   :  { %p1397_p12 = pnand %p1396_p11, %p1390_p8 }
  0xb0   :  { %1195 = vmatpush3.bf16.msra.mxu1 %v1570_v21  ;;  %1295 = vmatpush3.bf16.msra.mxu0 %v1575_v27 }
  0xb1   :  { %1197 = vmatprep.subr.bf16.mxu1 %v1587_v49  ;;  %1297 = vmatprep.subr.bf16.mxu0 %v1584_v41 }
  0xb4   :  { %1199 = vmatpush3.bf16.msra.mxu1 %v1587_v49  ;;  %1299 = vmatpush3.bf16.msra.mxu0 %v1584_v41  ;;  %v773_v41 = vpop.permute.xlu0 %772 }
  0xb5   :  { %1201 = vmatprep.subr.bf16.mxu1 %v1594_v5  ;;  %1301 = vmatprep.subr.bf16.mxu0 %v1597_v58  ;;  %vm777_vm2 = vcmp.eq.s32.totalorder %v1631_v26, %v773_v41 }
  0xb8   :  { %1203 = vmatpush3.bf16.msra.mxu1 %v1594_v5  ;;  %1303 = vmatpush3.bf16.msra.mxu0 %v1597_v58 }
  0xb9   :  { %1205 = vmatprep.subr.bf16.mxu1 %v1204_v22  ;;  %1305 = vmatprep.subr.bf16.mxu0 %v1601_v0 }
  0xbc   :  { %1207 = vmatpush3.bf16.msra.mxu1 %v1204_v22  ;;  %1307 = vmatpush3.bf16.msra.mxu0 %v1601_v0 }
  0xbd   :  { %1209 = vmatprep.subr.bf16.mxu1 %v1603_v7  ;;  %1309 = vmatprep.subr.bf16.mxu0 %v1468_v13 }
  0xbf   :  { %1111 = vmatmul.mubr.msk.f32.vlgmr.msra.gmra.mrb[0].mxu0 %vm58_vm1, %v1420_v48 }
  0xc0   :  { %1211 = vmatpush3.bf16.msra.mxu1 %v1603_v7  ;;  %1311 = vmatpush3.bf16.msra.mxu0 %v1468_v13 }
  0xc1   :  { %1145 = vmatprep.mubr.msk.f32.mxu0 %vm57_vm0, %v1420_v48  ;;  %1213 = vmatprep.subr.bf16.mxu1 %v1607_v10 }
  0xc2   :  { %1313 = vmatprep.subr.bf16.mxu0 %v1470_v16 }
  0xc3   :  { %1006 = vmatmul.mubr.msk.f32.vlgmr.msra.gmra.mrb[0].mxu1 %vm58_vm1, %v1420_v48 }
  0xc4   :  { %1215 = vmatpush3.bf16.msra.mxu1 %v1607_v10  ;;  %1040 = vmatprep.mubr.f32.mxu1 %v145_v51 }
  0xc5   :  { %1315 = vmatpush3.bf16.msra.mxu0 %v1470_v16  ;;  %1217 = vmatprep.subr.bf16.mxu1 %v1611_v28 }
  0xc6   :  { %1317 = vmatprep.subr.bf16.mxu0 %v1481_v20 }
  0xc8   :  { %1219 = vmatpush3.bf16.msra.mxu1 %v1611_v28 }
  0xc9   :  { %1319 = vmatpush3.bf16.msra.mxu0 %v1481_v20  ;;  %1221 = vmatprep.subr.bf16.mxu1 %v1615_v30 }
  0xca   :  { %1321 = vmatprep.subr.bf16.mxu0 %v1495_v32 }
  0xcc   :  { %1223 = vmatpush3.bf16.msra.mxu1 %v1615_v30 }
  0xcd   :  { %1323 = vmatpush3.bf16.msra.mxu0 %v1495_v32  ;;  %1225 = vmatprep.subr.bf16.mxu1 %v1619_v31 }
  0xce   :  { %1325 = vmatprep.subr.bf16.mxu0 %v1510_v40 }
  0xd0   :  { %1227 = vmatpush3.bf16.msra.mxu1 %v1619_v31 }
  0xd1   :  { %1327 = vmatpush3.bf16.msra.mxu0 %v1510_v40  ;;  %1229 = vmatprep.subr.bf16.mxu1 %v1623_v35 }
  0xd2   :  { %1329 = vmatprep.subr.bf16.mxu0 %v1538_v57 }
  0xd4   :  { %1231 = vmatpush3.bf16.msra.mxu1 %v1623_v35 }
  0xd5   :  { %1331 = vmatpush3.bf16.msra.mxu0 %v1538_v57  ;;  %1233 = vmatprep.subr.bf16.mxu1 %v1625_v29 }
  0xd6   :  { %1333 = vmatprep.subr.bf16.mxu0 %v1565_v15 }
  0xd8   :  { %1235 = vmatpush3.bf16.msra.mxu1 %v1625_v29 }
  0xd9   :  { %1335 = vmatpush3.bf16.msra.mxu0 %v1565_v15  ;;  %1237 = vmatprep.subr.bf16.mxu1 %v1627_v46 }
  0xda   :  { %1337 = vmatprep.subr.bf16.mxu0 %v1582_v36 }
  0xdc   :  { %1239 = vmatpush3.bf16.msra.mxu1 %v1627_v46 }
  0xdd   :  { %1339 = vmatpush3.bf16.msra.mxu0 %v1582_v36  ;;  %1241 = vmatprep.subr.bf16.mxu1 %v1629_v47 }
  0xe0   :  { %1146 = vmatmul.mubr.msk.f32.vlgmr.msra.gmra.mrb[0].mxu0 %vm58_vm1, %v1420_v48  ;;  %1243 = vmatpush3.bf16.msra.mxu1 %v1629_v47 }
  0xe3   :  { %1041 = vmatmul.mubr.f32.vlgmr.msra.gmra.mrb[0].mxu1 %v1643_v23 }
 0x1b3   :  { %v1147_v13 = vpop.f32.mrb[0].mxu0 }
 0x1b4   :  { %v737_v16 = vpop.f32.mrb[1].mxu0 }
 0x1b6   :  { %v1042_v20 = vpop.f32.mrb[0].mxu1 }
 0x1b7   :  { %v1340_v32 = vadd.f32 %v1147_v13, %v1042_v20  ;;  %v421_v34 = vpop.f32.mrb[1].mxu1 }
 0x1b8   :  { %v1341_v40 = vadd.f32 %v737_v16, %v421_v34 }
 0x1b9   :  { %748 = vst [vmem:[#allocation5 + $0x8] sm:$0xff] %v1340_v32  ;;  %753 = vmax.xlane.f32.xlu1 %v1340_v32 }
 0x1ba   :  { %747 = vst [vmem:[#allocation5] sm:$0xff] %v1341_v40  ;;  %v779_v56 = vsel %vm777_vm2, %v1341_v40, 0.0 }
 0x1bd   :  { %751 = vmax.xlane.f32.xlu1 %v1341_v40 }
 0x1ce   :  { %775 = vperm.xlu1 %1358, %v750_v50  }
 0x246   :  { %v754_v54 = vpop.xlane.xlu1 %753 }
 0x247   :  { %v756_v57 = vsub.f32 %v1340_v32, %v754_v54 }
 0x249   :  { %v759_v3 = vmul.f32 1.442695, %v756_v57 }
 0x24a   :  { %v752_v8 = vpop.xlane.xlu1 %751 }
 0x24b   :  { %1359 = vpow2.f32 %v759_v3  ;;  %v755_v15 = vsub.f32 %v1341_v40, %v752_v8 }
 0x24d   :  { %v757_v21 = vmul.f32 1.442695, %v755_v15 }
 0x24e   :  { %v776_v49 = vpop.permute.xlu1 %775 }
 0x24f   :  { %1361 = vpow2.f32 %v757_v21  ;;  %vm778_vm3 = vcmp.eq.s32.totalorder %v1631_v26, %v776_v49 }
 0x250   :  { %v780_v60 = vsel %vm778_vm3, %v1340_v32, 0.0 }
 0x255   :  { %v1360_v27 = vpop.eup %1359 }
 0x256   :  { %763 = vadd.xlane.f32.xlu1 %v1360_v27 }
 0x259   :  { %v1362_v36 = vpop.eup %1361 }
 0x25a   :  { %761 = vadd.xlane.f32.xlu0 %v1362_v36 }
 0x25e   :  { %781 = vadd.xlane.f32.xlu0 %v779_v56 }
 0x262   :  { %783 = vadd.xlane.f32.xlu0 %v780_v60 }
 0x263   :  { %1400 = shalt.err (!%p1397_p12)
}
 0x264   :  { %s1401_s13 = scalar_lea.hbm %s1756_s3, 256 }
 0x265   :  { %p1402_p13 = scmp.ne.s32.totalorder %s1756_s3, %s1401_s13  ;;  %p1405_p0 = scmp.lt.u32.totalorder %s1401_s13, %s1756_s3 }
 0x267   :  { %p1407_p1 = pnand %p1405_p0, %p1402_p13 }
 0x269   :  { %1410 = shalt.err (!%p1407_p1)
}
 0x26a   :  { %812 = dma.vmem_to_hbm [thread:$0]  %s807_s9, 256, %s1756_s3, [#allocation4], %s1416_s25, %s1416_s25, %s1417_s26   ;;  %vm798_vm4 = vcmask 7168  }
 0x2e3   :  { %v764_v61 = vpop.xlane.xlu1 %763 }
 0x2e4   :  { %1363 = vlog2.f32 %v764_v61 }
 0x2e7   :  { %v762_v1 = vpop.xlane.xlu0 %761 }
 0x2e8   :  { %1365 = vlog2.f32 %v762_v1 }
 0x2eb   :  { %v782_v2 = vpop.xlane.xlu0 %781 }
 0x2ee   :  { %v1364_v4 = vpop.eup %1363 }
 0x2ef   :  { %v768_v5 = vmul.f32 0.6931472, %v1364_v4  ;;  %v784_v45 = vpop.xlane.xlu0 %783 }
 0x2f1   :  { %v770_v42 = vadd.f32 %v768_v5, %v754_v54 }
 0x2f2   :  { %v1366_v53 = vpop.eup %1365 }
 0x2f3   :  { %v766_v58 = vmul.f32 0.6931472, %v1366_v53  ;;  %v786_v11 = vsub.f32 %v770_v42, %v784_v45 }
 0x2f5   :  { %v769_v12 = vadd.f32 %v766_v58, %v752_v8  ;;  %800 = vst.msk [vmem:[%s1757_s4 + $0x8] sm:$0xff] %vm798_vm4, %v786_v11 }
 0x2f7   :  { %v785_v14 = vsub.f32 %v769_v12, %v782_v2 }
 0x2f9   :  { %799 = vst.msk [vmem:[%s1757_s4] sm:$0xff] %vm798_vm4, %v785_v14 }
 0x2fa   :  { %1413 = dma.done.wait [#allocation4], 256  }
 0x2fb   :  { %1414 = vsyncadd [#allocation4], 4294967040 }
 0x2fc   :  { %820 = vsyncpa [#allocation3], 1 }
 0x2fd   :  { %821 = vsyncpa [#allocation4], 1 }

</bundles_post_ra>
